<compile_context>
chip_gen: v7x
topology: tpu7x:2x2x1
jax: 0.10.0
libtpu: 0.0.40
codegen_flags: <defaults>
</compile_context>

<pallas_src>
import jax
import jax.numpy as jnp
from jax.experimental import pallas as pl
from jax.experimental.pallas import tpu as pltpu


_MAX_INFLIGHT_DMAS = 4
_CHUNK_THRESHOLD_BYTES = 8 * 1024 * 1024  # only bother chunking big arrays


def _make_hbm_copy_kernel(chunks):
    """Build a kernel that copies `x` to `o` via chunked HBM->HBM DMAs.

    `chunks` is a tuple of static (start, size) slices along axis 0.
    """

    def kernel(x_hbm, o_hbm, sems):
        descs = []
        for idx, (start, size) in enumerate(chunks):
            cp = pltpu.make_async_copy(
                x_hbm.at[pl.ds(start, size)],
                o_hbm.at[pl.ds(start, size)],
                sems.at[idx],
            )
            cp.start()
            descs.append(cp)
        for cp in descs:
            cp.wait()

    return kernel


def identity_pallas(x: jax.Array, *, materialize: bool = False) -> jax.Array:
    """Identity forward pass.

    Default (materialize=False): returns `x` unchanged — zero HBM traffic, exactly
    matching nn.Identity semantics.

    materialize=True: produces a fresh buffer with identical contents via a Pallas
    HBM->HBM DMA copy kernel (no VMEM staging).
    """
    if not materialize:
        # True nn.Identity: no copy can ever beat no copy.
        return x

    if x.size == 0:
        return x  # nothing to copy

    orig_shape = x.shape
    xk = x.reshape(1) if x.ndim == 0 else x  # give scalars a leading dim for slicing

    dim0 = xk.shape[0]
    nbytes = int(xk.size) * xk.dtype.itemsize

    # Up to 4 in-flight DMAs over the leading dim for large arrays; otherwise one
    # full-array DMA (launch/prologue dominates for small inputs anyway).
    if nbytes >= _CHUNK_THRESHOLD_BYTES and dim0 >= 2:
        n_chunks = min(_MAX_INFLIGHT_DMAS, dim0)
    else:
        n_chunks = 1

    # Static, roughly equal slices of the leading dim (computed at trace time).
    base, rem = divmod(dim0, n_chunks)
    chunks = []
    start = 0
    for i in range(n_chunks):
        size = base + (1 if i < rem else 0)
        chunks.append((start, size))
        start += size

    out = pl.pallas_call(
        _make_hbm_copy_kernel(tuple(chunks)),
        out_shape=jax.ShapeDtypeStruct(xk.shape, xk.dtype),
        in_specs=[pl.BlockSpec(memory_space=pl.ANY)],
        out_specs=pl.BlockSpec(memory_space=pl.ANY),
        scratch_shapes=[pltpu.SemaphoreType.DMA((n_chunks,))],
        # Pure memory op: advise XLA so it can overlap it with neighboring compute.
        cost_estimate=pl.CostEstimate(
            flops=0, transcendentals=0, bytes_accessed=2 * nbytes
        ),
    )(xk)

    return out.reshape(orig_shape)


if __name__ == "__main__":
    key = jax.random.PRNGKey(0)

    # Small NCHW input consistent with a conv-style module: batch=2, channels=4, 16x16.
    x = jax.random.normal(key, (2, 4, 16, 16), dtype=jnp.float32)

    # Default path: true identity (no copy, no kernel).
    y0 = jax.block_until_ready(identity_pallas(x))
    assert y0.shape == x.shape and y0.dtype == x.dtype
    assert bool(jnp.all(y0 == x)), "identity output differs from input (no-copy path)"

    # Materialized copy path: exercises the Pallas HBM->HBM DMA kernel.
    y1 = jax.block_until_ready(identity_pallas(x, materialize=True))
    assert y1.shape == x.shape and y1.dtype == x.dtype
    assert bool(jnp.all(y1 == x)), "identity output differs from input (copy path)"

    # Awkward shape with no 128-multiple factor: the DMA path is shape/layout agnostic
    # (nothing is staged through vregs, so no masked partial stores).
    x_odd = jnp.arange(3 * 5 * 7, dtype=jnp.int32).reshape(3, 5, 7)
    y_odd = jax.block_until_ready(identity_pallas(x_odd, materialize=True))
    assert y_odd.shape == x_odd.shape and y_odd.dtype == x_odd.dtype
    assert bool(jnp.all(y_odd == x_odd)), "identity output differs (odd shape)"

    # Larger tensor (16 MiB) that triggers multiple in-flight chunked DMAs.
    x_big = jax.random.normal(jax.random.PRNGKey(1), (8, 512, 1024), dtype=jnp.float32)
    y_big = jax.block_until_ready(identity_pallas(x_big, materialize=True))
    assert y_big.shape == x_big.shape and y_big.dtype == x_big.dtype
    assert bool(jnp.all(y_big == x_big)), "identity output differs (big tensor)"

    print("KERNEL_OK")
</pallas_src>

<mosaic_0001>
module attributes {stable_mosaic.version = 11 : i64} {
  func.func @kernel(%arg0: memref<2x4x16x16xf32, #tpu.memory_space<any>>, %arg1: memref<2x4x16x16xf32, #tpu.memory_space<any>>, %arg2: memref<1x!tpu.dma_semaphore, #tpu.memory_space<semaphore_mem>>) attributes {dimension_semantics = [], scalar_prefetch = 0 : i64, scratch_operands = 1 : i64, tpu.core_type = #tpu.core_type<tc>} {
    %c0_i32 = arith.constant 0 : i32
    %c0_i32_0 = arith.constant 0 : i32
    %c0_i32_1 = arith.constant 0 : i32
    %c0_i32_2 = arith.constant 0 : i32
    %c0_i32_3 = arith.constant 0 : i32
    %0 = tpu.memref_slice %arg0[%c0_i32_0, %c0_i32_1, %c0_i32_2, %c0_i32_3] : memref<2x4x16x16xf32, #tpu.memory_space<any>> -> memref<2x4x16x16xf32, #tpu.memory_space<any>>
    %c0_i32_4 = arith.constant 0 : i32
    %c0_i32_5 = arith.constant 0 : i32
    %c0_i32_6 = arith.constant 0 : i32
    %c0_i32_7 = arith.constant 0 : i32
    %1 = tpu.memref_slice %arg1[%c0_i32_4, %c0_i32_5, %c0_i32_6, %c0_i32_7] : memref<2x4x16x16xf32, #tpu.memory_space<any>> -> memref<2x4x16x16xf32, #tpu.memory_space<any>>
    %2 = tpu.memref_slice %arg2[%c0_i32] : memref<1x!tpu.dma_semaphore, #tpu.memory_space<semaphore_mem>> -> memref<1x!tpu.dma_semaphore, #tpu.memory_space<semaphore_mem>>
    %3 = tpu.memref_squeeze %2 : memref<1x!tpu.dma_semaphore, #tpu.memory_space<semaphore_mem>> -> memref<!tpu.dma_semaphore, #tpu.memory_space<semaphore_mem>>
    tpu.enqueue_dma source(%0 : memref<2x4x16x16xf32, #tpu.memory_space<any>>) target(%1 : memref<2x4x16x16xf32, #tpu.memory_space<any>>) target_semaphore(%3 : memref<!tpu.dma_semaphore, #tpu.memory_space<semaphore_mem>>)
    %c0_i32_8 = arith.constant 0 : i32
    %c0_i32_9 = arith.constant 0 : i32
    %c0_i32_10 = arith.constant 0 : i32
    %c0_i32_11 = arith.constant 0 : i32
    %c0_i32_12 = arith.constant 0 : i32
    %4 = tpu.memref_slice %arg0[%c0_i32_9, %c0_i32_10, %c0_i32_11, %c0_i32_12] : memref<2x4x16x16xf32, #tpu.memory_space<any>> -> memref<2x4x16x16xf32, #tpu.memory_space<any>>
    %c0_i32_13 = arith.constant 0 : i32
    %c0_i32_14 = arith.constant 0 : i32
    %c0_i32_15 = arith.constant 0 : i32
    %c0_i32_16 = arith.constant 0 : i32
    %5 = tpu.memref_slice %arg1[%c0_i32_13, %c0_i32_14, %c0_i32_15, %c0_i32_16] : memref<2x4x16x16xf32, #tpu.memory_space<any>> -> memref<2x4x16x16xf32, #tpu.memory_space<any>>
    %6 = tpu.memref_slice %arg2[%c0_i32_8] : memref<1x!tpu.dma_semaphore, #tpu.memory_space<semaphore_mem>> -> memref<1x!tpu.dma_semaphore, #tpu.memory_space<semaphore_mem>>
    %7 = tpu.memref_squeeze %6 : memref<1x!tpu.dma_semaphore, #tpu.memory_space<semaphore_mem>> -> memref<!tpu.dma_semaphore, #tpu.memory_space<semaphore_mem>>
    tpu.wait_dma2 semaphore(%7 : memref<!tpu.dma_semaphore, #tpu.memory_space<semaphore_mem>>) src(%4 : memref<2x4x16x16xf32, #tpu.memory_space<any>>) dst(%5 : memref<2x4x16x16xf32, #tpu.memory_space<any>>)
    return
  }
}

</mosaic_0001>

<bundles_post_ra>
// kernel: tpu_custom_call.1
= control target key start
LH: loop header
LB: loop body
LE: loop exit
PB: predicated region body
PF: predicated region fallthrough
CT: control target
= control target key end

     0   :  { %s36_s6 = smov [#allocation2]   ;;  %s37_s7 = smov [#allocation3]   ;;  %s55_s0 = inlined_call_operand.hbm [shape: f32[2,4,16,16], index: 0, kind: input, shape index: {}]   ;;  %s56_s1 = inlined_call_operand.hbm [shape: f32[2,4,16,16], index: 1, kind: output, shape index: {}]  }
   0x1   :  { %s38_s8 = smov 0  }
   0x2   :  { %18 = dma.general %s55_s0, 2048, %s56_s1, %s36_s6, %s37_s7, [#allocation4], %s38_s8, 0  }
   0x3   :  { %34 = dma.done.wait [#allocation2], 2048 }
   0x4   :  { %35 = vsyncadd [#allocation2], 4294965248 }
   0x5   :  { %24 = vsyncmov [#allocation2] }
   0x8   :  { %s25_s13 = vpop.sfrf %24 }
   0x9   :  { %p30_p0 = scmp.ne.s32.totalorder %s25_s13, 0 }
   0xb   :  { %29 = shalt.err (%p30_p0)  }

</bundles_post_ra>
